<compile_context>
chip_gen: v7x
topology: tpu7x:2x2x1
jax: 0.10.0
libtpu: 0.0.40
codegen_flags: <defaults>
</compile_context>

<pallas_src>
import functools
import math

import jax
import jax.numpy as jnp
from jax.experimental import pallas as pl
from jax.experimental.pallas import tpu as pltpu


_TILE = 128          # row / neighbour tile target (fits v5e/v6e/v7x budgets)
_INF = 1e30
_BIG_ID = 2 ** 30


def _pad_rows(v):
    """Pad the vertex count to a multiple of 8 (small) or 128 (large)."""
    if v <= _TILE:
        return max(8, ((v + 7) // 8) * 8)
    return ((v + _TILE - 1) // _TILE) * _TILE


# ----------------------------------------------------------------------------
# Feature transform: sigmoid(x @ W_cat + b_cat); W_cat = per-batch masked
# weights folded along the lane axis -> [F, B*T].  Output bf16.
# ----------------------------------------------------------------------------
def _ft_kernel(x_ref, w_ref, b_ref, o_ref):
    y = jnp.dot(x_ref[...].astype(jnp.bfloat16), w_ref[...],
                preferred_element_type=jnp.float32) + b_ref[...]
    o_ref[...] = jax.nn.sigmoid(y).astype(o_ref.dtype)


def feature_transform(x, w_cat, b_cat, tv):
    Vp, F = x.shape
    BT = w_cat.shape[1]
    return pl.pallas_call(
        _ft_kernel,
        out_shape=jax.ShapeDtypeStruct((Vp, BT), jnp.bfloat16),
        grid=(Vp // tv,),
        in_specs=[
            pl.BlockSpec((tv, F), lambda i: (i, 0)),
            pl.BlockSpec((F, BT), lambda i: (0, 0)),
            pl.BlockSpec((1, BT), lambda i: (0, 0)),
        ],
        out_specs=pl.BlockSpec((tv, BT), lambda i: (i, 0)),
        compiler_params=pltpu.CompilerParams(
            dimension_semantics=("parallel",)),
    )(x, w_cat, b_cat)


# ----------------------------------------------------------------------------
# Per-layer prep: Xl = h@Wl, Xr = h@Wr (hoisted out of the attention loop)
# and |h|^2 per row (reused by the kNN kernel).
# ----------------------------------------------------------------------------
def _prep_kernel(h_ref, wl_ref, wr_ref, xl_ref, xr_ref, n_ref):
    h = h_ref[...]
    xl_ref[...] = jnp.dot(h, wl_ref[...],
                          preferred_element_type=jnp.float32).astype(xl_ref.dtype)
    xr_ref[...] = jnp.dot(h, wr_ref[...],
                          preferred_element_type=jnp.float32).astype(xr_ref.dtype)
    hf = h.astype(jnp.float32)
    n_ref[...] = jnp.sum(hf * hf, axis=-1, keepdims=True)


def gat_prep(h, wl, wr, tv):
    B, Vp, Cin = h.shape
    C = wl.shape[1]
    return pl.pallas_call(
        _prep_kernel,
        out_shape=(jax.ShapeDtypeStruct((B, Vp, C), jnp.bfloat16),
                   jax.ShapeDtypeStruct((B, Vp, C), jnp.bfloat16),
                   jax.ShapeDtypeStruct((B, Vp, 1), jnp.float32)),
        grid=(B, Vp // tv),
        in_specs=[
            pl.BlockSpec((None, tv, Cin), lambda b, i: (b, i, 0)),
            pl.BlockSpec((Cin, C), lambda b, i: (0, 0)),
            pl.BlockSpec((Cin, C), lambda b, i: (0, 0)),
        ],
        out_specs=(
            pl.BlockSpec((None, tv, C), lambda b, i: (b, i, 0)),
            pl.BlockSpec((None, tv, C), lambda b, i: (b, i, 0)),
            pl.BlockSpec((None, tv, 1), lambda b, i: (b, i, 0)),
        ),
        compiler_params=pltpu.CompilerParams(
            dimension_semantics=("parallel", "parallel")),
    )(h, wl, wr)


# ----------------------------------------------------------------------------
# Fused pairwise-distance + running top-k kernel.
# Grid (B, i-tile, j-tile); the j axis is a reduction carrying a (ti, k)
# best-distance / best-index scratch.  Self pairs and padded columns excluded.
# ----------------------------------------------------------------------------
def _argmin_extract(d, ids, k):
    """k iterative (min, argmin-by-smallest-id) extractions along last axis."""
    best_d, best_i = [], []
    for _ in range(k):
        m = jnp.min(d, axis=-1, keepdims=True)
        am = jnp.min(jnp.where(d == m, ids, _BIG_ID), axis=-1, keepdims=True)
        best_d.append(m)
        best_i.append(am)
        d = jnp.where(ids == am, _INF, d)
    return jnp.concatenate(best_d, axis=-1), jnp.concatenate(best_i, axis=-1)


def _knn_kernel(k, n_valid, hi_ref, hj_ref, ni_ref, nj_ref, idx_ref,
                bd_sc, bi_sc):
    jt = pl.program_id(2)
    ti = hi_ref.shape[0]
    tj = hj_ref.shape[0]

    @pl.when(jt == 0)
    def _():
        bd_sc[...] = jnp.full_like(bd_sc, _INF)
        # distinct negative sentinels so the merge masking never collides
        bi_sc[...] = jax.lax.broadcasted_iota(jnp.int32, bi_sc.shape, 1) - k

    # Gram-form distances: |xi|^2 + |xj|^2 - 2 xi.xj (bf16 matmul, f32 acc).
    g = jax.lax.dot_general(hi_ref[...], hj_ref[...],
                            (((1,), (1,)), ((), ())),
                            preferred_element_type=jnp.float32)   # (ti, tj)
    d = ni_ref[...] + nj_ref[...].T - 2.0 * g
    r = pl.program_id(1) * ti + jax.lax.broadcasted_iota(jnp.int32, (ti, tj), 0)
    c = jt * tj + jax.lax.broadcasted_iota(jnp.int32, (ti, tj), 1)
    d = jnp.where((r == c) | (c >= n_valid), _INF, d)

    # k best of this tile, then merge with the running best.
    td, tidx = _argmin_extract(d, c, k)
    cat_d = jnp.concatenate([bd_sc[...], td], axis=-1)           # (ti, 2k)
    cat_i = jnp.concatenate([bi_sc[...], tidx], axis=-1)
    new_d, new_i = _argmin_extract(cat_d, cat_i, k)
    bd_sc[...] = new_d
    bi_sc[...] = new_i

    @pl.when(jt == pl.num_programs(2) - 1)
    def _():
        idx_ref[...] = jnp.clip(bi_sc[...], 0, n_valid - 1)


def knn_topk(h, nrm, k, n_valid, tv):
    B, Vp, C = h.shape
    return pl.pallas_call(
        functools.partial(_knn_kernel, k, n_valid),
        out_shape=jax.ShapeDtypeStruct((B, Vp, k), jnp.int32),
        grid=(B, Vp // tv, Vp // tv),
        in_specs=[
            pl.BlockSpec((None, tv, C), lambda b, i, j: (b, i, 0)),
            pl.BlockSpec((None, tv, C), lambda b, i, j: (b, j, 0)),
            pl.BlockSpec((None, tv, 1), lambda b, i, j: (b, i, 0)),
            pl.BlockSpec((None, tv, 1), lambda b, i, j: (b, j, 0)),
        ],
        out_specs=pl.BlockSpec((None, tv, k), lambda b, i, j: (b, i, 0)),
        scratch_shapes=[pltpu.VMEM((tv, k), jnp.float32),
                        pltpu.VMEM((tv, k), jnp.int32)],
        compiler_params=pltpu.CompilerParams(
            dimension_semantics=("parallel", "parallel", "arbitrary")),
    )(h, h, nrm, nrm)


# ----------------------------------------------------------------------------
# Gather-based GATv2 attention over the kNN graph + self loop.
#   e_ij = a . leaky_relu(Xr_i + Xl_j),  alpha = softmax over k+1,
#   out_i = relu(sum_j alpha_ij Xl_j + b)
# ----------------------------------------------------------------------------
def _gat_kernel(neg_slope, k, xr_ref, xl_ref, xln_ref, a_ref, b_ref, o_ref):
    xr = xr_ref[...].astype(jnp.float32)                 # (tv, C)
    a = a_ref[...]                                       # (1, C)

    def score(xv):
        t = xr + xv
        t = jnp.where(t > 0, t, neg_slope * t)           # leaky relu
        return jnp.sum(t * a, axis=-1, keepdims=True)    # (tv, 1)

    xl_self = xl_ref[...].astype(jnp.float32)
    s_list = [score(xl_self)]
    for kk in range(k):
        s_list.append(score(xln_ref[kk].astype(jnp.float32)))

    m = s_list[0]
    for s in s_list[1:]:
        m = jnp.maximum(m, s)
    p_list = [jnp.exp(s - m) for s in s_list]
    denom = p_list[0]
    for p in p_list[1:]:
        denom = denom + p
    inv = pl.reciprocal(denom, approx=True)

    acc = (p_list[0] * inv) * xl_self
    for kk in range(k):
        acc = acc + (p_list[kk + 1] * inv) * xln_ref[kk].astype(jnp.float32)
    o_ref[...] = jnp.maximum(acc + b_ref[...], 0.0).astype(o_ref.dtype)


def gat_attend(xr, xl, xln, a, bias, tv, neg_slope=0.2):
    B, Vp, C = xl.shape
    k = xln.shape[1]
    return pl.pallas_call(
        functools.partial(_gat_kernel, neg_slope, k),
        out_shape=jax.ShapeDtypeStruct((B, Vp, C), jnp.bfloat16),
        grid=(B, Vp // tv),
        in_specs=[
            pl.BlockSpec((None, tv, C), lambda b, i: (b, i, 0)),        # Xr
            pl.BlockSpec((None, tv, C), lambda b, i: (b, i, 0)),        # Xl self
            pl.BlockSpec((None, k, tv, C), lambda b, i: (b, 0, i, 0)),  # Xl nbrs
            pl.BlockSpec((1, C), lambda b, i: (0, 0)),                  # a
            pl.BlockSpec((1, C), lambda b, i: (0, 0)),                  # bias
        ],
        out_specs=pl.BlockSpec((None, tv, C), lambda b, i: (b, i, 0)),
        compiler_params=pltpu.CompilerParams(
            dimension_semantics=("parallel", "parallel")),
    )(xr, xl, xln, a, bias)


def _gather_neighbors(xl, idx):
    # TODO(synk): neighbour-row gather done with XLA advanced indexing between
    # kernels; an in-kernel DMA/scalar gather would remove this [B,k,V,C] HBM
    # round trip (k=4 so the traffic is small).
    idx_t = jnp.transpose(idx, (0, 2, 1))                # [B, k, Vp]
    return jax.vmap(lambda m, i: m[i, :])(xl, idx_t)     # [B, k, Vp, C]


# ----------------------------------------------------------------------------
# Fused head: batch-max of the (implicit) concat, one K=d_cat matmul against
# the unsplit w1, then Linear+ReLU -> geod * tanh(c * Linear).  The final
# store is 128-lane wide (w3/b3 zero-padded); the real 3 columns are sliced
# outside.
# ----------------------------------------------------------------------------
def _head_kernel(c, n_chunks, *refs):
    hs = refs[:n_chunks]
    w1_ref, b1_ref, w2_ref, b2_ref, w3_ref, b3_ref, g_ref, o_ref = refs[n_chunks:]
    maxed = [jnp.max(h_ref[...], axis=0) for h_ref in hs]     # bf16 (tv, C_l)
    hcat = jnp.concatenate(maxed, axis=-1)                    # (tv, d_cat) bf16
    h1 = jnp.maximum(
        jnp.dot(hcat, w1_ref[...], preferred_element_type=jnp.float32)
        + b1_ref[...], 0.0)
    h2 = jnp.maximum(
        jnp.dot(h1.astype(jnp.bfloat16), w2_ref[...],
                preferred_element_type=jnp.float32) + b2_ref[...], 0.0)
    y = jnp.dot(h2.astype(jnp.bfloat16), w3_ref[...],
                preferred_element_type=jnp.float32) + b3_ref[...]
    o_ref[...] = g_ref[...] * jnp.tanh(jnp.float32(c) * y)


def fused_head(feats, w1, b1, w2, b2, w3, b3, geod, c, tv):
    B, Vp, _ = feats[0].shape
    n = len(feats)
    in_specs = []
    for f in feats:
        ci = f.shape[2]
        in_specs.append(pl.BlockSpec((B, tv, ci), lambda i: (0, i, 0)))
    in_specs += [
        pl.BlockSpec(w1.shape, lambda i: (0, 0)),
        pl.BlockSpec(b1.shape, lambda i: (0, 0)),
        pl.BlockSpec(w2.shape, lambda i: (0, 0)),
        pl.BlockSpec(b2.shape, lambda i: (0, 0)),
        pl.BlockSpec(w3.shape, lambda i: (0, 0)),
        pl.BlockSpec(b3.shape, lambda i: (0, 0)),
        pl.BlockSpec((tv, 1), lambda i: (i, 0)),
    ]
    return pl.pallas_call(
        functools.partial(_head_kernel, c, n),
        out_shape=jax.ShapeDtypeStruct((Vp, w3.shape[1]), jnp.float32),
        grid=(Vp // tv,),
        in_specs=in_specs,
        out_specs=pl.BlockSpec((tv, w3.shape[1]), lambda i: (i, 0)),
        compiler_params=pltpu.CompilerParams(
            dimension_semantics=("parallel",)),
    )(*feats, w1, b1, w2, b2, w3, b3, geod)


# ----------------------------------------------------------------------------
# Model
# ----------------------------------------------------------------------------
def _glorot(key, shape):
    fan_in = shape[-2] if len(shape) >= 2 else shape[0]
    return jax.random.normal(key, shape, dtype=jnp.float32) / jnp.sqrt(
        jnp.float32(fan_in))


class MultiMaxDisplacerNetPallas:
    def __init__(self, k, mesh_input_features, mesh_edge_lengths,
                 in_feature_mask, out_channels_list=(32, 64, 64, 64),
                 out_transf_channels=32):
        self.k = k
        self.no_graph_layers = len(out_channels_list)
        self.out_transf_channels = out_transf_channels
        self.no_batches = len(in_feature_mask)

        V = int(mesh_input_features.shape[0])
        assert V > k, "need at least k+1 vertices for kNN"
        self.V = V
        self.Vp = _pad_rows(V)
        self.tv = min(_TILE, self.Vp)

        F = int(in_feature_mask[0].shape[0])
        T = out_transf_channels
        B = self.no_batches
        key = jax.random.PRNGKey(42)                     # seed_everything(42)
        keys = iter(jax.random.split(key, 64))

        # FeatureTransformLayer: per-batch feature-masked Linear(F->T)+sigmoid,
        # folded into one [F, B*T] matmul.
        mask = jnp.stack([jnp.asarray(m).astype(jnp.float32)
                          for m in in_feature_mask])      # [B, F]
        w_ft = _glorot(next(keys), (B, F, T)) * mask[:, :, None]
        self.w_ft = jnp.transpose(w_ft, (1, 0, 2)).reshape(F, B * T).astype(
            jnp.bfloat16)
        self.b_ft = jnp.zeros((1, B * T), jnp.float32)

        # GATv2 layers (single head, dynamic kNN graph + self loops, ReLU).
        self.gat_params = []
        cin = T
        for cout in out_channels_list:
            wl = _glorot(next(keys), (cin, cout)).astype(jnp.bfloat16)
            wr = _glorot(next(keys), (cin, cout)).astype(jnp.bfloat16)
            a = _glorot(next(keys), (1, cout))
            bias = jnp.zeros((1, cout), jnp.float32)
            self.gat_params.append((wl, wr, a, bias))
            cin = cout

        # MLP head: single unsplit w1 (K = d_cat), w3/b3 zero-padded to 128
        # output lanes so the final store is lane-dense.
        d_cat = T + sum(out_channels_list)
        self.w1 = _glorot(next(keys), (d_cat, 256)).astype(jnp.bfloat16)
        self.b1 = jnp.zeros((1, 256), jnp.float32)
        self.w2 = _glorot(next(keys), (256, 64)).astype(jnp.bfloat16)
        self.b2 = jnp.zeros((1, 64), jnp.float32)
        w3 = _glorot(next(keys), (64, 3))
        self.w3 = jnp.zeros((64, 128), jnp.float32).at[:, :3].set(w3).astype(
            jnp.bfloat16)
        self.b3 = jnp.zeros((1, 128), jnp.float32)

        # GeodLinear scale: geod * tanh(c * linear(x)).
        # TODO(synk): assumes F > 8 (mesh.input_features[:, 8]), as in the spec.
        geod = jnp.abs(jnp.asarray(mesh_input_features)[:, 8]).reshape(-1, 1)
        self.geod = jnp.zeros((self.Vp, 1), jnp.float32).at[:V].set(
            geod.astype(jnp.float32))
        self.c = float(math.atanh(0.9) /
                       float(jnp.mean(jnp.asarray(mesh_edge_lengths))))

    def __call__(self, x):
        V, Vp, B, T = self.V, self.Vp, self.no_batches, self.out_transf_channels
        assert x.shape[0] == V
        if Vp != V:
            x = jnp.zeros((Vp, x.shape[1]), x.dtype).at[:V].set(x)

        # [Vp, B*T] -> [B, Vp, T]; equals torch cat(split(., T, dim=1), dim=0).
        ft = feature_transform(x, self.w_ft, self.b_ft, self.tv)
        h = jnp.transpose(ft.reshape(Vp, B, T), (1, 0, 2))       # [B, Vp, T]

        outs = [h]
        for (wl, wr, a, bias) in self.gat_params:
            h_in = outs[-1]
            xl, xr, nrm = gat_prep(h_in, wl, wr, self.tv)        # hoisted proj.
            idx = knn_topk(h_in, nrm, self.k, V, self.tv)        # [B, Vp, k]
            xln = _gather_neighbors(xl, idx)                     # [B, k, Vp, C]
            outs.append(gat_attend(xr, xl, xln, a, bias, self.tv))

        y = fused_head(outs, self.w1, self.b1, self.w2, self.b2,
                       self.w3, self.b3, self.geod, self.c, self.tv)
        return y[:V, :3]


# ----------------------------------------------------------------------------
if __name__ == "__main__":
    V, F, B, k = 16, 12, 2, 4
    key0 = jax.random.PRNGKey(0)
    kx, kmesh, kedge = jax.random.split(key0, 3)

    x = jax.random.normal(kx, (V, F), dtype=jnp.float32)
    mesh_input_features = jax.random.normal(kmesh, (V, F), dtype=jnp.float32)
    mesh_edge_lengths = jnp.abs(
        jax.random.normal(kedge, (3 * V,), dtype=jnp.float32)) + 0.1

    in_feature_mask = [jnp.arange(F) < 8, jnp.arange(F) >= (F - 8)]

    model = MultiMaxDisplacerNetPallas(
        k, mesh_input_features, mesh_edge_lengths, in_feature_mask,
        out_channels_list=(32, 64, 64, 64), out_transf_channels=32)

    out = jax.block_until_ready(model(x))
    assert out.shape == (V, 3), out.shape
    assert bool(jnp.all(jnp.isfinite(out)))
    print("KERNEL_OK")
</pallas_src>

<mosaic_0001>
module attributes {stable_mosaic.version = 11 : i64} {
  func.func @_ft_kernel(%arg0: i32, %arg1: memref<16x12xf32, #tpu.memory_space<vmem>>, %arg2: memref<12x64xbf16, #tpu.memory_space<vmem>>, %arg3: memref<1x64xf32, #tpu.memory_space<vmem>>, %arg4: memref<16x64xbf16, #tpu.memory_space<vmem>>) attributes {dimension_semantics = [#tpu.dimension_semantics<parallel>], iteration_bounds = array<i64: 1>, scalar_prefetch = 0 : i64, scratch_operands = 0 : i64, tpu.core_type = #tpu.core_type<tc>, window_params = [{transform_indices = @transform_0, window_bounds = array<i64: 16, 12>}, {pipeline_mode = #tpu.pipeline_mode<synchronous>, transform_indices = @transform_1, window_bounds = array<i64: 12, 64>}, {pipeline_mode = #tpu.pipeline_mode<synchronous>, transform_indices = @transform_2, window_bounds = array<i64: 1, 64>}, {transform_indices = @transform_3, window_bounds = array<i64: 16, 64>}]} {
    %c0 = arith.constant 0 : index
    %c0_0 = arith.constant 0 : index
    %0 = vector.load %arg1[%c0, %c0_0] : memref<16x12xf32, #tpu.memory_space<vmem>>, vector<16x12xf32>
    %1 = arith.truncf %0 : vector<16x12xf32> to vector<16x12xbf16>
    %c0_1 = arith.constant 0 : index
    %c0_2 = arith.constant 0 : index
    %2 = vector.load %arg2[%c0_1, %c0_2] : memref<12x64xbf16, #tpu.memory_space<vmem>>, vector<12x64xbf16>
    %cst = arith.constant dense<0.000000e+00> : vector<16x64xf32>
    %3 = tpu.matmul %1, %2, %cst {dimension_numbers = #tpu.dot_dimension_numbers<[1], [0], [0], [1], [0, 0, 1, 1], [], []>} : vector<16x12xbf16>, vector<12x64xbf16>, vector<16x64xf32> -> vector<16x64xf32>
    %c0_3 = arith.constant 0 : index
    %c0_4 = arith.constant 0 : index
    %4 = vector.load %arg3[%c0_3, %c0_4] : memref<1x64xf32, #tpu.memory_space<vmem>>, vector<1x64xf32>
    %5 = vector.broadcast %4 : vector<1x64xf32> to vector<16x64xf32>
    %6 = arith.addf %3, %5 : vector<16x64xf32>
    %7 = arith.negf %6 : vector<16x64xf32>
    %8 = math.exp %7 : vector<16x64xf32>
    %cst_5 = arith.constant 1.000000e+00 : f32
    %9 = vector.broadcast %cst_5 : f32 to vector<16x64xf32>
    %10 = arith.addf %9, %8 : vector<16x64xf32>
    %11 = arith.divf %9, %10 : vector<16x64xf32>
    %12 = arith.truncf %11 : vector<16x64xf32> to vector<16x64xbf16>
    %c0_6 = arith.constant 0 : index
    %c0_7 = arith.constant 0 : index
    %13 = vector.load %arg4[%c0_6, %c0_7] : memref<16x64xbf16, #tpu.memory_space<vmem>>, vector<16x64xbf16>
    tpu.vector_store %arg4[%c0_6, %c0_7], %12 {strides = array<i32>} : memref<16x64xbf16, #tpu.memory_space<vmem>>, vector<16x64xbf16>,
    return
  }
  func.func @transform_0(%arg0: i32) -> (i32, i32) {
    %c0_i32 = arith.constant 0 : i32
    %c0_i32_0 = arith.constant 0 : i32
    return %arg0, %c0_i32 : i32, i32
  }
  func.func @transform_1(%arg0: i32) -> (i32, i32) {
    %c0_i32 = arith.constant 0 : i32
    %c0_i32_0 = arith.constant 0 : i32
    %c0_i32_1 = arith.constant 0 : i32
    return %c0_i32, %c0_i32_0 : i32, i32
  }
  func.func @transform_2(%arg0: i32) -> (i32, i32) {
    %c0_i32 = arith.constant 0 : i32
    %c0_i32_0 = arith.constant 0 : i32
    %c0_i32_1 = arith.constant 0 : i32
    return %c0_i32, %c0_i32_0 : i32, i32
  }
  func.func @transform_3(%arg0: i32) -> (i32, i32) {
    %c0_i32 = arith.constant 0 : i32
    %c0_i32_0 = arith.constant 0 : i32
    return %arg0, %c0_i32 : i32, i32
  }
}

</mosaic_0001>

<bundles_post_ra>
// kernel: tpu_custom_call.1
= control target key start
LH: loop header
LB: loop body
LE: loop exit
PB: predicated region body
PF: predicated region fallthrough
CT: control target
= control target key end

     0   :  { %8 = vsyncpa [#allocation3], 0  ;;  %s332_s0 = inlined_call_operand.hbm [shape: f32[16,12], index: 0, kind: input, shape index: {}]   ;;  %s333_s1 = inlined_call_operand.hbm [shape: bf16[12,64], index: 1, kind: input, shape index: {}]   ;;  %s334_s2 = inlined_call_operand.vmem [shape: f32[1,64], index: 2, kind: input, shape index: {}]   ;;  %s335_s3 = inlined_call_operand.hbm [shape: bf16[16,64], index: 3, kind: output, shape index: {}]  }
   0x1   :  { %9 = vsyncpa [#allocation6], 0 }
   0x2   :  { %10 = vsyncpa [#allocation4], 0  ;;  %s258_s12 = smov [#allocation2]   ;;  %s186_s16 = scalar_lea.hbm %s332_s0, 256 }
   0x3   :  { %s16_s13 = sshll.u32 %s258_s12, 4  ;;  %p187_p0 = scmp.ne.s32.totalorder %s332_s0, %s186_s16  ;;  %s17_s13 = int_to_ptr.vmem [resolvable:$true] %s16_s13 }
   0x4   :  { %p190_p1 = scmp.lt.u32.totalorder %s186_s16, %s332_s0 }
   0x6   :  { %p192_p2 = pnand %p190_p1, %p187_p0 }
   0x8   :  { %195 = shalt.err (!%p192_p2)
}
   0x9   :  { %s196_s21 = scalar_lea.vmem %s17_s13, 256  ;;  %p201_p4 = scmp.lt.s32.totalorder %s17_s13, %s17_s13 }
   0xa   :  { %p197_p3 = scmp.ne.s32.totalorder %s17_s13, %s196_s21  ;;  %p202_p5 = scmp.lt.s32.totalorder %s196_s21, %s196_s21 }
   0xc   :  { %p203_p6 = por %p202_p5, %p201_p4 }
   0xe   :  { %p204_p7 = pnand %p203_p6, %p197_p3 }
  0x10   :  { %207 = shalt.err (!%p204_p7)
}
  0x11   :  { %s259_s22 = smov 128   ;;  %s260_s23 = smov 8  }
  0x12   :  { %22 = dma.hbm_to_vmem [thread:$0]  %s332_s0, 256, %s17_s13, [#allocation3], %s259_s22, %s259_s22, %s260_s23  }
  0x13   :  { %s261_s26 = smov [#allocation5]   ;;  %s208_s30 = scalar_lea.hbm %s333_s1, 128 }
  0x14   :  { %s28_s27 = sshll.u32 %s261_s26, 4  ;;  %p209_p8 = scmp.ne.s32.totalorder %s333_s1, %s208_s30  ;;  %s29_s27 = int_to_ptr.vmem [resolvable:$true] %s28_s27 }
  0x15   :  { %p212_p9 = scmp.lt.u32.totalorder %s208_s30, %s333_s1 }
  0x17   :  { %p214_p10 = pnand %p212_p9, %p209_p8 }
  0x19   :  { %217 = shalt.err (!%p214_p10)
}
  0x1a   :  { %s218_s8 = scalar_lea.vmem %s29_s27, 128  ;;  %p223_p12 = scmp.lt.s32.totalorder %s29_s27, %s29_s27 }
  0x1b   :  { %p219_p11 = scmp.ne.s32.totalorder %s29_s27, %s218_s8  ;;  %p224_p13 = scmp.lt.s32.totalorder %s218_s8, %s218_s8 }
  0x1d   :  { %p225_p0 = por %p224_p13, %p223_p12 }
  0x1f   :  { %p226_p1 = pnand %p225_p0, %p219_p11 }
  0x21   :  { %229 = shalt.err (!%p226_p1)
}
  0x22   :  { %s262_s0 = smov 64   ;;  %s263_s9 = smov 4  }
  0x23   :  { %34 = dma.hbm_to_vmem [thread:$0]  %s333_s1, 128, %s29_s27, [#allocation6], %s262_s0, %s262_s0, %s263_s9  }
  0x24   :  { %252 = dma.done.wait [#allocation3], 256  }
  0x25   :  { %253 = vsyncadd [#allocation3], 4294967040 }
  0x26   :  { %254 = dma.done.wait [#allocation6], 128  }
  0x27   :  { %255 = vsyncadd [#allocation6], 4294967168  ;;  %v264_v0 = vmov 0.0   ;;  %vm265_vm0 = vmmov 0   ;;  %vm65_vm1 = vcmask 1045504   ;;  %v44_v2 = vld [vmem:[#allocation2] sm:$0xff] }
  0x28   :  { %162 = vmatprep.subr.bf16.mxu0 %v264_v0  ;;  %164 = vmatprep.mubr.msk.bf16.mxu0 %vm265_vm0, %v264_v0  ;;  %v177_v1 = vld [vmem:[#allocation5] sm:$0x3f]   ;;  %v45_v3 = vld [vmem:[#allocation2 + $0x8] sm:$0xff]  ;;  %vm61_vm2 = vcmask 97280   ;;  %v151_v6 = vld [vmem:[%s334_s2] ss:$0 sm:$0xff] }
  0x29   :  { %v67_v4 = vsel %vm65_vm1, %v177_v1, 0  ;;  %v46_v5 = vpack.c.bf16 %v45_v3, %v44_v2  ;;  %vm130_vm3 = vcmask 519168   ;;  %s266_s1 = smov [#allocation7]  }
  0x2a   :  { %163 = vmatpush3.bf16.msra.mxu0 %v67_v4  ;;  %s138_s2 = sshll.u32 %s266_s1, 4  ;;  %s139_s2 = int_to_ptr.vmem [resolvable:$true] %s138_s2 }
  0x2b   :  { %s230_s14 = scalar_lea.vmem %s139_s2, 128  ;;  %p235_p3 = scmp.lt.s32.totalorder %s139_s2, %s139_s2 }
  0x2c   :  { %p231_p2 = scmp.ne.s32.totalorder %s139_s2, %s230_s14  ;;  %p236_p4 = scmp.lt.s32.totalorder %s230_s14, %s230_s14 }
  0x2d   :  { %165 = vmatmul.mubr.msk.bf16.vlgmr.msra.gmra.mrb[0].mxu0 %vm61_vm2, %v46_v5 }
  0x2e   :  { %p237_p5 = por %p236_p4, %p235_p3 }
  0x30   :  { %p238_p6 = pnand %p237_p5, %p231_p2 }
 0x100   :  { %v103_v7 = vpop.f32.mrb[0].mxu0 }
 0x101   :  { %v104_v8 = vadd.f32 %v151_v6, %v103_v7  ;;  %v166_v9 = vpop.f32.mrb[1].mxu0 }
 0x102   :  { %v106_v10 = vpop.f32.mrb[2].mxu0 }
 0x103   :  { %v154_v11 = vmul.f32 -1.442695, %v104_v8  ;;  %v107_v12 = vadd.f32 %v151_v6, %v106_v10  ;;  %v167_v13 = vpop.f32.mrb[3].mxu0 }
 0x105   :  { %178 = vpow2.f32 %v154_v11  ;;  %v155_v14 = vmul.f32 -1.442695, %v107_v12 }
 0x107   :  { %180 = vpow2.f32 %v155_v14 }
 0x10f   :  { %v179_v15 = vpop.eup %178 }
 0x110   :  { %v116_v16 = vadd.f32 1.0, %v179_v15 }
 0x111   :  { %v181_v17 = vpop.eup %180 }
 0x112   :  { %182 = vrcp.f32 %v116_v16  ;;  %v117_v18 = vadd.f32 1.0, %v181_v17 }
 0x114   :  { %184 = vrcp.f32 %v117_v18 }
 0x11c   :  { %v183_v19 = vpop.eup %182 }
 0x11d   :  { %v158_v20 = vpack.c.bf16 %v183_v19, %v183_v19 }
 0x11e   :  { %v185_v21 = vpop.eup %184 }
 0x11f   :  { %v159_v22 = vpack.c.bf16 %v185_v21, %v185_v21  ;;  %131 = vst.msk [vmem:[#allocation7] sm:$0xf] %vm130_vm3, %v158_v20 }
 0x121   :  { %132 = vst.msk [vmem:[#allocation7 + $0x4] sm:$0xf] %vm130_vm3, %v159_v22 }
 0x122   :  { %241 = shalt.err (!%p238_p6)
}
 0x123   :  { %s242_s17 = scalar_lea.hbm %s335_s3, 128 }
 0x124   :  { %p243_p7 = scmp.ne.s32.totalorder %s335_s3, %s242_s17  ;;  %p246_p8 = scmp.lt.u32.totalorder %s242_s17, %s335_s3 }
 0x126   :  { %p248_p9 = pnand %p246_p8, %p243_p7 }
 0x128   :  { %251 = shalt.err (!%p248_p9)
}
 0x129   :  { %144 = dma.vmem_to_hbm [thread:$0]  %s139_s2, 128, %s335_s3, [#allocation4], %s262_s0, %s262_s0, %s263_s9  }
 0x12a   :  { %256 = dma.done.wait [#allocation4], 128  }
 0x12b   :  { %257 = vsyncadd [#allocation4], 4294967168 }
 0x12c   :  { %148 = vsyncpa [#allocation3], 1 }
 0x12d   :  { %149 = vsyncpa [#allocation6], 1 }
 0x12e   :  { %150 = vsyncpa [#allocation4], 1 }

</bundles_post_ra>
